<compile_context>
chip_gen: v5e
topology: v5e:2x2
jax: 0.10.0
libtpu: 0.0.40
codegen_flags: <defaults>
</compile_context>

<pallas_src>
import jax
import jax.numpy as jnp
from jax.experimental import pallas as pl
from jax.experimental.pallas import tpu as pltpu


def _round_up(x, m):
    return ((x + m - 1) // m) * m


def _hw_config():
    """Best-effort hardware introspection; falls back to conservative defaults."""
    vmem_cap = 64 * 1024 * 1024          # v7x per-TensorCore VMEM (smallest in fleet)
    mxu_dim = 128                        # v5e MXU granule (safe everywhere)
    multi_core = False
    kind = ""
    try:
        kind = jax.devices()[0].device_kind.lower()
    except Exception:
        pass
    try:
        vmem_cap = int(pltpu.get_tpu_info().vmem_capacity_bytes)
    except Exception:
        pass
    if ("v6" in kind) or ("v7" in kind):
        mxu_dim = 256                    # 2x256x256 MXU on v6e / v7x
    if "v7" in kind:
        multi_core = True                # 2 TensorCores share the "parallel" grid axis
    return mxu_dim, vmem_cap, multi_core


def _mlp_kernel(x_ref, w1_ref, b1_ref, w2_ref, b2_ref, o_ref):
    # fc1 on the MXU: cast x to the compute dtype in-kernel (hides under the
    # matmul and avoids a wrapper-side HBM rewrite of x); accumulate in f32.
    x = x_ref[...].astype(w1_ref.dtype)
    h = jnp.dot(x, w1_ref[...], preferred_element_type=jnp.float32)
    h = jnp.maximum(h + b1_ref[...], 0.0)                       # bias + ReLU (VPU)
    # fc2 (output width 1): VPU multiply against the broadcast [1, H] w2 row +
    # lane reduce; one tiny XLU transpose turns the [block_b, 1] column into a
    # lane-dense [1, block_b] row so the store uses full 128-lane vst.
    y = jnp.sum(h * w2_ref[...], axis=-1, keepdims=True)        # [block_b, 1]
    y = jnp.transpose(y) + b2_ref[0]                            # [1, block_b]
    o_ref[...] = y.astype(o_ref.dtype)


def resnet50_fc_forward(x, w1, b1, w2, b2, *, block_b=None,
                        compute_dtype=jnp.bfloat16,
                        vmem_budget_bytes=None):
    """Forward pass of ResNet50FC.

    x : [B, input_size]
    w1: [input_size, hidden_size]   (fc1.weight.T)
    b1: [hidden_size]               (fc1.bias)
    w2: [hidden_size, 1]            (fc2.weight.T)
    b2: [1]                         (fc2.bias)
    returns [B, 1] in x.dtype
    """
    B, D = x.shape
    H = w1.shape[1]
    out_dtype = x.dtype

    mxu_dim, vmem_cap, multi_core = _hw_config()
    if vmem_budget_bytes is None:
        vmem_budget_bytes = int(0.70 * vmem_cap)
    vmem_limit_bytes = max(int(0.85 * vmem_cap), 16 * 1024 * 1024)

    cbytes = jnp.dtype(compute_dtype).itemsize
    xbytes = jnp.dtype(x.dtype).itemsize
    sublane = max(8, 32 // max(xbytes, 1))       # sublane packing of x tiles

    # K / N padding: 128 granules on v5e, 256 on v6e/v7x; never inflate a dim
    # that already fits a single 128 granule.
    def _pad_dim(n):
        return _round_up(n, 128) if n <= 128 else _round_up(n, mxu_dim)
    D_pad = _pad_dim(D)
    H_pad = _pad_dim(H)

    # --- batch tile sizing from the VMEM budget ------------------------------
    # Resident (single copy): W1, b1, w2.  Per row: x tile (x dtype, double
    # buffered), its in-kernel bf16 copy, the f32 hidden h, the h*w2
    # temporary, and the (double buffered) output row.
    fixed = D_pad * H_pad * cbytes + 2 * H_pad * 4 + (1 << 16)
    per_row = 2 * D_pad * xbytes + D_pad * cbytes + 2 * H_pad * 4 + 2 * 4
    avail = max(vmem_budget_bytes - fixed, 1 << 20)
    cap = min(max(int(avail // per_row), sublane), 4096)

    B_sub = _round_up(B, sublane)
    if block_b is None:
        block_b = cap
    block_b = max(sublane, _round_up(block_b, sublane))
    if block_b >= B_sub:
        block_b = B_sub                              # whole batch in one grid step
    else:
        block_b = max(128, (block_b // 128) * 128)   # multi-block -> 128-aligned rows

    num_blocks = -(-B // block_b)

    # v7x: keep the grid even so both TensorCores split *real* work (no padding
    # blocks are ever added just to reach 2 steps).
    if multi_core:
        if num_blocks == 1 and B >= 256:
            block_b = _round_up(-(-B // 2), 128)
            num_blocks = -(-B // block_b)
        elif num_blocks > 1 and num_blocks % 2 == 1:
            block_b = max(128, _round_up(-(-B // (num_blocks + 1)), 128))
            num_blocks = -(-B // block_b)
    B_pad = num_blocks * block_b

    # --- operand prep (no x cast; pad only when actually needed) -------------
    if (B_pad != B) or (D_pad != D):
        x_p = jnp.pad(x, ((0, B_pad - B), (0, D_pad - D)))
    else:
        x_p = x
    w1_p = jnp.pad(w1.astype(compute_dtype), ((0, D_pad - D), (0, H_pad - H)))
    b1_p = jnp.pad(b1.astype(jnp.float32).reshape(1, H), ((0, 0), (0, H_pad - H)))
    w2_p = jnp.pad(w2.astype(jnp.float32).reshape(1, H), ((0, 0), (0, H_pad - H)))
    b2_s = b2.astype(jnp.float32).reshape(1)

    out_row = pl.pallas_call(
        _mlp_kernel,
        out_shape=jax.ShapeDtypeStruct((1, B_pad), out_dtype),
        grid_spec=pltpu.PrefetchScalarGridSpec(
            num_scalar_prefetch=0,
            grid=(num_blocks,),
            in_specs=[
                pl.BlockSpec((block_b, D_pad), lambda i: (i, 0)),     # x tile (pipelined)
                pl.BlockSpec(memory_space=pltpu.MemorySpace.VMEM),    # W1 resident, single copy
                pl.BlockSpec(memory_space=pltpu.MemorySpace.VMEM),    # b1 row
                pl.BlockSpec(memory_space=pltpu.MemorySpace.VMEM),    # w2 row
                pl.BlockSpec(memory_space=pltpu.MemorySpace.SMEM),    # b2 scalar
            ],
            out_specs=pl.BlockSpec((1, block_b), lambda i: (0, i)),   # lane-dense row
        ),
        compiler_params=pltpu.CompilerParams(
            dimension_semantics=("parallel",),
            vmem_limit_bytes=vmem_limit_bytes,
        ),
    )(x_p, w1_p, b1_p, w2_p, b2_s)

    return out_row.reshape(B_pad, 1)[:B]


def init_params(key, input_size, hidden_size, dtype=jnp.float32):
    """Deterministic init mimicking nn.Linear defaults: U(-1/sqrt(fan_in), 1/sqrt(fan_in))."""
    k1, k2, k3, k4 = jax.random.split(key, 4)
    bound1 = 1.0 / (input_size ** 0.5)
    bound2 = 1.0 / (hidden_size ** 0.5)
    w1 = jax.random.uniform(k1, (input_size, hidden_size), dtype, -bound1, bound1)
    b1 = jax.random.uniform(k2, (hidden_size,), dtype, -bound1, bound1)
    w2 = jax.random.uniform(k3, (hidden_size, 1), dtype, -bound2, bound2)
    b2 = jax.random.uniform(k4, (1,), dtype, -bound2, bound2)
    return w1, b1, w2, b2


if __name__ == "__main__":
    key = jax.random.PRNGKey(0)
    kx, kp = jax.random.split(key)

    batch = 8
    input_size = 32
    hidden_size = 32

    x = jax.random.normal(kx, (batch, input_size), dtype=jnp.float32)
    w1, b1, w2, b2 = init_params(kp, input_size, hidden_size)

    fwd = jax.jit(resnet50_fc_forward)
    out = jax.block_until_ready(fwd(x, w1, b1, w2, b2))

    # Reference matching the kernel's numerics (bf16 fc1 with f32 accum, f32 fc2).
    h_ref = jnp.maximum(
        jnp.dot(x.astype(jnp.bfloat16), w1.astype(jnp.bfloat16),
                preferred_element_type=jnp.float32) + b1[None, :], 0.0)
    ref = h_ref @ w2 + b2[None, :]

    assert out.shape == (batch, 1)
    assert out.dtype == x.dtype
    assert jnp.allclose(out, ref, atol=1e-2, rtol=1e-2), \
        float(jnp.max(jnp.abs(out - ref)))

    print("KERNEL_OK")
</pallas_src>

<mosaic_0001>
module attributes {stable_mosaic.version = 11 : i64} {
  func.func @_mlp_kernel(%arg0: i32, %arg1: memref<8x128xf32, #tpu.memory_space<vmem>>, %arg2: memref<128x128xbf16, #tpu.memory_space<vmem>>, %arg3: memref<1x128xf32, #tpu.memory_space<vmem>>, %arg4: memref<1x128xf32, #tpu.memory_space<vmem>>, %arg5: memref<1xf32, #tpu.memory_space<smem>>, %arg6: memref<1x8xf32, #tpu.memory_space<vmem>>) attributes {dimension_semantics = [#tpu.dimension_semantics<parallel>], iteration_bounds = array<i64: 1>, scalar_prefetch = 0 : i64, scratch_operands = 0 : i64, tpu.core_type = #tpu.core_type<tc>, window_params = [{transform_indices = @transform_0, window_bounds = array<i64: 8, 128>}, {pipeline_mode = #tpu.pipeline_mode<synchronous>, transform_indices = @transform_1, window_bounds = array<i64: 128, 128>}, {pipeline_mode = #tpu.pipeline_mode<synchronous>, transform_indices = @transform_2, window_bounds = array<i64: 1, 128>}, {pipeline_mode = #tpu.pipeline_mode<synchronous>, transform_indices = @transform_3, window_bounds = array<i64: 1, 128>}, {transform_indices = @transform_4, window_bounds = array<i64: 1>}, {transform_indices = @transform_5, window_bounds = array<i64: 1, 8>}]} {
    %c0 = arith.constant 0 : index
    %c0_0 = arith.constant 0 : index
    %0 = vector.load %arg1[%c0, %c0_0] : memref<8x128xf32, #tpu.memory_space<vmem>>, vector<8x128xf32>
    %1 = arith.truncf %0 : vector<8x128xf32> to vector<8x128xbf16>
    %c0_1 = arith.constant 0 : index
    %c0_2 = arith.constant 0 : index
    %2 = vector.load %arg2[%c0_1, %c0_2] : memref<128x128xbf16, #tpu.memory_space<vmem>>, vector<128x128xbf16>
    %cst = arith.constant dense<0.000000e+00> : vector<8x128xf32>
    %3 = tpu.matmul %1, %2, %cst {dimension_numbers = #tpu.dot_dimension_numbers<[1], [0], [0], [1], [0, 0, 1, 1], [], []>} : vector<8x128xbf16>, vector<128x128xbf16>, vector<8x128xf32> -> vector<8x128xf32>
    %c0_3 = arith.constant 0 : index
    %c0_4 = arith.constant 0 : index
    %4 = vector.load %arg3[%c0_3, %c0_4] : memref<1x128xf32, #tpu.memory_space<vmem>>, vector<1x128xf32>
    %5 = vector.broadcast %4 : vector<1x128xf32> to vector<8x128xf32>
    %6 = arith.addf %3, %5 : vector<8x128xf32>
    %cst_5 = arith.constant 0.000000e+00 : f32
    %7 = vector.broadcast %cst_5 : f32 to vector<8x128xf32>
    %8 = arith.maximumf %6, %7 : vector<8x128xf32>
    %c0_6 = arith.constant 0 : index
    %c0_7 = arith.constant 0 : index
    %9 = vector.load %arg4[%c0_6, %c0_7] : memref<1x128xf32, #tpu.memory_space<vmem>>, vector<1x128xf32>
    %10 = vector.broadcast %9 : vector<1x128xf32> to vector<8x128xf32>
    %11 = arith.mulf %8, %10 : vector<8x128xf32>
    %cst_8 = arith.constant dense<0.000000e+00> : vector<8xf32>
    %12 = vector.multi_reduction <add>, %11, %cst_8 [1] : vector<8x128xf32> to vector<8xf32>
    %13 = vector.shape_cast %12 : vector<8xf32> to vector<8x1xf32>
    %14 = tpu.transpose %13, [1, 0] : vector<8x1xf32> -> vector<1x8xf32>
    %c0_9 = arith.constant 0 : index
    %15 = memref.load %arg5[%c0_9] : memref<1xf32, #tpu.memory_space<smem>>
    %16 = vector.broadcast %15 : f32 to vector<1x8xf32>
    %17 = arith.addf %14, %16 : vector<1x8xf32>
    %c0_10 = arith.constant 0 : index
    %c0_11 = arith.constant 0 : index
    %18 = vector.load %arg6[%c0_10, %c0_11] : memref<1x8xf32, #tpu.memory_space<vmem>>, vector<1x8xf32>
    tpu.vector_store %arg6[%c0_10, %c0_11], %17 {strides = array<i32>} : memref<1x8xf32, #tpu.memory_space<vmem>>, vector<1x8xf32>,
    return
  }
  func.func @transform_0(%arg0: i32) -> (i32, i32) {
    %c0_i32 = arith.constant 0 : i32
    %c0_i32_0 = arith.constant 0 : i32
    return %arg0, %c0_i32 : i32, i32
  }
  func.func @transform_1(%arg0: i32) -> (i32, i32) {
    %c0_i32 = arith.constant 0 : i32
    %c0_i32_0 = arith.constant 0 : i32
    %c0_i32_1 = arith.constant 0 : i32
    return %c0_i32, %c0_i32_0 : i32, i32
  }
  func.func @transform_2(%arg0: i32) -> (i32, i32) {
    %c0_i32 = arith.constant 0 : i32
    %c0_i32_0 = arith.constant 0 : i32
    %c0_i32_1 = arith.constant 0 : i32
    return %c0_i32, %c0_i32_0 : i32, i32
  }
  func.func @transform_3(%arg0: i32) -> (i32, i32) {
    %c0_i32 = arith.constant 0 : i32
    %c0_i32_0 = arith.constant 0 : i32
    %c0_i32_1 = arith.constant 0 : i32
    return %c0_i32, %c0_i32_0 : i32, i32
  }
  func.func @transform_4(%arg0: i32) -> i32 {
    %c0_i32 = arith.constant 0 : i32
    %c0_i32_0 = arith.constant 0 : i32
    return %c0_i32 : i32
  }
  func.func @transform_5(%arg0: i32) -> (i32, i32) {
    %c0_i32 = arith.constant 0 : i32
    %c0_i32_0 = arith.constant 0 : i32
    return %c0_i32, %arg0 : i32, i32
  }
}

</mosaic_0001>

<bundles_post_ra>
// kernel: resnet50_fc_forward.1
= control target key start
LH: loop header
LB: loop body
LE: loop exit
PB: predicated region body
PF: predicated region fallthrough
CT: control target
= control target key end

     0   :  { %s306_s0 = inlined_call_operand.vmem [shape: f32[8,128], index: 0, kind: input, shape index: {}]   ;;  %s307_s1 = inlined_call_operand.vmem [shape: bf16[128,128], index: 1, kind: input, shape index: {}]   ;;  %s308_s2 = inlined_call_operand.vmem [shape: f32[1,128], index: 2, kind: input, shape index: {}]   ;;  %s309_s3 = inlined_call_operand.vmem [shape: f32[1,128], index: 3, kind: input, shape index: {}]   ;;  %s310_s4 = inlined_call_operand.<no memory space> [shape: f32[1], index: 4, kind: input, shape index: {}]   ;;  %s311_s5 = inlined_call_operand.hbm [shape: f32[1,8], index: 5, kind: output, shape index: {}]  }
   0x1   :  { %v205_v0 = vld [vmem:[%s307_s1 + $0x38] sm:$0xff]  ;;  %v204_v1 = vld [vmem:[%s307_s1 + $0x30] sm:$0xff] }
   0x2   :  { %92 = vmatpush.bf16.msra.mxu0 %v205_v0 }
   0x3   :  { %11 = vsyncpa [#allocation4], 0  ;;  %v203_v2 = vld [vmem:[%s307_s1 + $0x28] sm:$0xff]  ;;  %v202_v3 = vld [vmem:[%s307_s1 + $0x20] sm:$0xff]  ;;  %v146_v18 = vstv %s310_s4  ;;  %s236_s15 = smov [#allocation3]   ;;  %s157_s18 = sshll.u32 %s311_s5, 4  ;;  %s158_s18 = int_to_ptr.hbm [resolvable:$true] %s157_s18 }
   0x4   :  { %v201_v4 = vld [vmem:[%s307_s1 + $0x18] sm:$0xff]  ;;  %v200_v5 = vld [vmem:[%s307_s1 + $0x10] sm:$0xff]  ;;  %v199_v6 = vld [vmem:[%s307_s1 + $0x8] sm:$0xff]  ;;  %s155_s16 = sshll.u32 %s236_s15, 4  ;;  %vm148_vm0 = vcmask 57344   ;;  %s156_s16 = int_to_ptr.vmem [resolvable:$true] %s155_s16 }
   0x5   :  { %v198_v7 = vld [vmem:[%s307_s1] sm:$0xff] }
   0x6   :  { %93 = vmatpush.bf16.msra.mxu0 %v204_v1  ;;  %v22_v8 = vld [vmem:[%s306_s0] sm:$0xff] }
   0x7   :  { %v23_v9 = vpack.c.bf16 %v22_v8, %v22_v8  ;;  %v208_v10 = vld [vmem:[%s308_s2] ss:$0 sm:$0xff] }
   0x8   :  { %v209_v13 = vld [vmem:[%s309_s3] ss:$0 sm:$0xff] }
   0xa   :  { %94 = vmatpush.bf16.msra.mxu0 %v203_v2 }
   0xe   :  { %95 = vmatpush.bf16.msra.mxu0 %v202_v3 }
  0x12   :  { %96 = vmatpush.bf16.msra.mxu0 %v201_v4 }
  0x16   :  { %97 = vmatpush.bf16.msra.mxu0 %v200_v5 }
  0x1a   :  { %98 = vmatpush.bf16.msra.mxu0 %v199_v6 }
  0x1e   :  { %99 = vmatpush.bf16.msra.mxu0 %v198_v7 }
  0x21   :  { %100 = vmatmul.bf16.vlgmr.msra.gmra.mxu0 %v23_v9 }
  0x9e   :  { %v101_v11 = vpop.f32.mrf.mxu0 }
  0x9f   :  { %v102_v12 = vadd.f32 %v208_v10, %v101_v11 }
  0xa1   :  { %v105_v14 = vmax.f32 %v102_v12, 0.0 }
  0xa3   :  { %v110_v15 = vmul.f32 %v209_v13, %v105_v14 }
  0xa5   :  { %111 = vadd.xlane.f32.xlu0 %v110_v15 }
  0xa6   :  { %v103_v16 = vpop.f32.mrf.mxu0 }
 0x118   :  { %v112_v17 = vpop.xlane.xlu0 %111 }
 0x119   :  { %113 = vxpose.xlu0.b32.start.end [1/1] (short) (narrow) %v112_v17, 8 }
 0x1bd   :  { %v129_v19 = vpop.trf.xlu0 }
 0x1be   :  { %v147_v20 = vadd.f32 %v146_v18, %v129_v19 }
 0x1c0   :  { %149 = vst.msk [vmem:[#allocation3] sm:$0x1] %vm148_vm0, %v147_v20 }
 0x1c1   :  { %160 = dma.vmem_to_hbm [thread:$0]  %s156_s16, 16, %s158_s18, [#allocation4]  }
 0x1c2   :  { %234 = dma.done.wait [#allocation4], 16  }
 0x1c3   :  { %235 = vsyncadd [#allocation4], 4294967280 }
 0x1c4   :  { %165 = vsyncpa [#allocation4], 1 }

</bundles_post_ra>
